<compile_context>
chip_gen: v5e
topology: v5e:2x2
jax: 0.10.0
libtpu: 0.0.40
codegen_flags: <defaults>
</compile_context>

<pallas_src>
import numpy as np
import jax
import jax.numpy as jnp
from jax.experimental import pallas as pl
from jax.experimental.pallas import tpu as pltpu

IN_FEATURES = 20
OUT_FEATURES = 4
BATCH = 25                          # smallest batch for which reshape(-1,4,5,5) works
STACK = 4                           # torch.stack((x, x, x, x), dim=0)
FLAT_LEN = 2 * BATCH * OUT_FEATURES # 200 (two concatenated copies)


def _fused_forward_kernel(x_ref, w_ref, meta_ref, o_ref):
    # Column-expanded addmm (single MXU pass):
    #   z[r, f] = (x @ W^T)[r, col_of[f]]
    z = jnp.dot(x_ref[...], w_ref[...], preferred_element_type=jnp.float32)   # (25, 200)

    # In-kernel one-hot row selection: mask[r, f] = (r == row_of[f]).
    # row_of values are small exact integers, so the f32 compare is exact.
    row_ids = jax.lax.broadcasted_iota(jnp.int32, z.shape, 0).astype(jnp.float32)
    row_of = meta_ref[0:1, :]                                                  # (1, 200)
    picked = jnp.where(row_ids == row_of, z, 0.0)

    # Sublane reduce gives the flattened/permuted/duplicated vector; bias is
    # added after the reduce (exactly one nonzero per lane -> bit-identical).
    flat = jnp.sum(picked, axis=0, keepdims=True) + meta_ref[1:2, :]           # (1, 200)

    # stack((flat, flat, flat, flat), dim=0): every output row is identical.
    o_ref[...] = jnp.broadcast_to(flat, o_ref.shape)                           # (4, 200)


def _flat_source_indices(batch, out_features):
    """Flat index into the row-major (batch, out_features) linear output for
    each element of flatten(permute(reshape(z, (-1,4,5,5)), [3,0,1,2]))
    duplicated twice (cat-then-flatten interpretation of flatten((x, x)))."""
    total = batch * out_features
    src = np.arange(total, dtype=np.int64).reshape(-1, 4, 5, 5)
    src = np.transpose(src, (3, 0, 1, 2)).reshape(-1)
    return np.concatenate([src, src])            # (2 * total,)


def make_forward(w, b):
    """w: (4, 20) PyTorch Linear layout, b: (4,).  Returns jitted forward(x)."""
    src = _flat_source_indices(BATCH, OUT_FEATURES)          # (200,)
    row_of = src // OUT_FEATURES
    col_of = src % OUT_FEATURES

    w_np = np.asarray(w, dtype=np.float32)                   # (4, 20)
    b_np = np.asarray(b, dtype=np.float32)                   # (4,)

    # Init-time parameter layout transform (exact column copies, no rounding):
    #   W_exp[:, f] = W^T[:, col_of[f]]
    w_exp = np.ascontiguousarray(w_np.T[:, col_of]).astype(np.float32)   # (20, 200)

    # Packed per-lane metadata: row 0 = row_of (as exact f32), row 1 = bias.
    meta = np.zeros((2, FLAT_LEN), np.float32)
    meta[0, :] = row_of.astype(np.float32)
    meta[1, :] = b_np[col_of]

    w_exp = jnp.asarray(w_exp)
    meta = jnp.asarray(meta)

    fused = pl.pallas_call(
        _fused_forward_kernel,
        # Emit the final (4, 200) directly; full-array block, no padding slice.
        out_shape=jax.ShapeDtypeStruct((STACK, FLAT_LEN), jnp.float32),
        in_specs=[pl.BlockSpec(memory_space=pltpu.MemorySpace.VMEM)] * 3,
        out_specs=pl.BlockSpec(memory_space=pltpu.MemorySpace.VMEM),
        # VMEM is a non-issue here (~40 KiB live); keep a small, comfy cap.
        compiler_params=pltpu.CompilerParams(vmem_limit_bytes=4 * 1024 * 1024),
    )

    @jax.jit
    def forward(x):
        # The row_of/col_of tables are baked for BATCH=25; guard at trace time.
        assert x.shape == (BATCH, IN_FEATURES), x.shape
        return fused(x, w_exp, meta)                          # (4, 200)

    return forward


if __name__ == "__main__":
    key = jax.random.PRNGKey(0)
    kx, kw, kb = jax.random.split(key, 3)

    x = jax.random.normal(kx, (BATCH, IN_FEATURES), dtype=jnp.float32)
    # deterministic "Linear(20, 4)" parameters (PyTorch layout)
    bound = 1.0 / (IN_FEATURES ** 0.5)
    w = jax.random.uniform(
        kw, (OUT_FEATURES, IN_FEATURES), dtype=jnp.float32,
        minval=-bound, maxval=bound)
    b = jax.random.uniform(
        kb, (OUT_FEATURES,), dtype=jnp.float32, minval=-bound, maxval=bound)

    forward = make_forward(w, b)
    out = forward(x)
    jax.block_until_ready(out)

    # pure-JAX reference of the same interpretation
    z = x @ w.T + b
    y = jnp.transpose(z.reshape(-1, 4, 5, 5), (3, 0, 1, 2))
    flat = jnp.concatenate([y.reshape(-1), y.reshape(-1)])
    ref = jnp.stack([flat] * STACK, axis=0)

    assert out.shape == (STACK, FLAT_LEN)
    assert jnp.allclose(out, ref, atol=1e-5, rtol=1e-5)

    print("KERNEL_OK")
</pallas_src>

<mosaic_0001>
module attributes {stable_mosaic.version = 11 : i64} {
  func.func @_fused_forward_kernel(%arg0: memref<25x20xf32, #tpu.memory_space<vmem>>, %arg1: memref<20x200xf32, #tpu.memory_space<vmem>>, %arg2: memref<2x200xf32, #tpu.memory_space<vmem>>, %arg3: memref<4x200xf32, #tpu.memory_space<vmem>>) attributes {dimension_semantics = [], scalar_prefetch = 0 : i64, scratch_operands = 0 : i64, tpu.core_type = #tpu.core_type<tc>} {
    %c0 = arith.constant 0 : index
    %c0_0 = arith.constant 0 : index
    %0 = vector.load %arg0[%c0, %c0_0] : memref<25x20xf32, #tpu.memory_space<vmem>>, vector<25x20xf32>
    %c0_1 = arith.constant 0 : index
    %c0_2 = arith.constant 0 : index
    %1 = vector.load %arg1[%c0_1, %c0_2] : memref<20x200xf32, #tpu.memory_space<vmem>>, vector<20x200xf32>
    %cst = arith.constant dense<0.000000e+00> : vector<25x200xf32>
    %2 = tpu.matmul %0, %1, %cst {dimension_numbers = #tpu.dot_dimension_numbers<[1], [0], [0], [1], [0, 0, 1, 1], [], []>} : vector<25x20xf32>, vector<20x200xf32>, vector<25x200xf32> -> vector<25x200xf32>
    %3 = tpu.iota {dimensions = array<i32: 0>} : vector<25x200xi32>
    %4 = arith.sitofp %3 : vector<25x200xi32> to vector<25x200xf32>
    %c0_3 = arith.constant 0 : index
    %c0_4 = arith.constant 0 : index
    %5 = vector.load %arg2[%c0_3, %c0_4] : memref<2x200xf32, #tpu.memory_space<vmem>>, vector<1x200xf32>
    %6 = vector.broadcast %5 : vector<1x200xf32> to vector<25x200xf32>
    %7 = arith.cmpf oeq, %4, %6 : vector<25x200xf32>
    %cst_5 = arith.constant 0.000000e+00 : f32
    %8 = vector.broadcast %cst_5 : f32 to vector<25x200xf32>
    %9 = arith.select %7, %2, %8 : vector<25x200xi1>, vector<25x200xf32>
    %cst_6 = arith.constant dense<0.000000e+00> : vector<200xf32>
    %10 = vector.multi_reduction <add>, %9, %cst_6 [0] : vector<25x200xf32> to vector<200xf32>
    %11 = vector.shape_cast %10 : vector<200xf32> to vector<1x200xf32>
    %c1 = arith.constant 1 : index
    %c0_7 = arith.constant 0 : index
    %12 = vector.load %arg2[%c1, %c0_7] : memref<2x200xf32, #tpu.memory_space<vmem>>, vector<1x200xf32>
    %13 = arith.addf %11, %12 : vector<1x200xf32>
    %14 = vector.shape_cast %13 : vector<1x200xf32> to vector<1x200xf32>
    %15 = vector.broadcast %14 : vector<1x200xf32> to vector<4x200xf32>
    %c0_8 = arith.constant 0 : index
    %c0_9 = arith.constant 0 : index
    %16 = vector.load %arg3[%c0_8, %c0_9] : memref<4x200xf32, #tpu.memory_space<vmem>>, vector<4x200xf32>
    tpu.vector_store %arg3[%c0_8, %c0_9], %15 {strides = array<i32>} : memref<4x200xf32, #tpu.memory_space<vmem>>, vector<4x200xf32>,
    return
  }
}

</mosaic_0001>

<bundles_post_ra>
// kernel: forward.1
= control target key start
LH: loop header
LB: loop body
LE: loop exit
PB: predicated region body
PF: predicated region fallthrough
CT: control target
= control target key end

     0   :  { %vm38_vm0 = vcmask 1043456   ;;  %s320_s0 = inlined_call_operand.vmem [shape: f32[25,20], index: 0, kind: input, shape index: {}]   ;;  %s321_s1 = inlined_call_operand.vmem [shape: f32[20,200], index: 1, kind: input, shape index: {}]   ;;  %s322_s2 = inlined_call_operand.vmem [shape: f32[2,200], index: 2, kind: input, shape index: {}]   ;;  %s323_s3 = inlined_call_operand.hbm [shape: f32[4,200], index: 3, kind: output, shape index: {}]  }
   0x1   :  { %v23_v0 = vld [vmem:[%s321_s1 + $0x20] sm:$0xf]  ;;  %v24_v1 = vld [vmem:[%s321_s1 + $0x28] sm:$0xf]  ;;  %v21_v2 = vld [vmem:[%s321_s1 + $0x10] sm:$0xff] }
   0x2   :  { %195 = vmatpush.msk.msra.mxu0 %vm38_vm0, %v23_v0  ;;  %206 = vmatpush.msk.msra.mxu2 %vm38_vm0, %v23_v0  ;;  %v22_v3 = vld [vmem:[%s321_s1 + $0x18] sm:$0xff]  ;;  %v19_v4 = vld [vmem:[%s321_s1] sm:$0xff]  ;;  %v20_v5 = vld [vmem:[%s321_s1 + $0x8] sm:$0xff] }
   0x3   :  { %200 = vmatpush.msk.msra.mxu1 %vm38_vm0, %v24_v1  ;;  %209 = vmatpush.msk.msra.mxu3 %vm38_vm0, %v24_v1 }
   0x4   :  { %59 = vmatpush.msra.mxu0 %v21_v2  ;;  %207 = vmatpush.msra.mxu2 %v21_v2 }
   0x5   :  { %8 = vsyncpa [#allocation3], 0  ;;  %88 = vmatpush.msra.mxu1 %v22_v3  ;;  %210 = vmatpush.msra.mxu3 %v22_v3  ;;  %v15_v6 = vld [vmem:[%s320_s0] sm:$0xff]  ;;  %vm25_vm1 = vcmask 162816   ;;  %v17_v7 = vld [vmem:[%s320_s0 + $0x10] sm:$0xff]  ;;  %v103_v10 = vlaneseq  ;;  %vm145_vm6 = vcmask 588800  }
   0x6   :  { %60 = vmatpush.msra.mxu0 %v19_v4  ;;  %208 = vmatpush.msra.mxu2 %v19_v4  ;;  %v16_v8 = vld [vmem:[%s320_s0 + $0x8] sm:$0xff]  ;;  %v18_v9 = vld [vmem:[%s320_s0 + $0x18] sm:$0x1]  ;;  %v112_v12 = vld [vmem:[%s322_s2] ss:$2 sm:$0x3] }
   0x7   :  { %89 = vmatpush.msra.mxu1 %v20_v5  ;;  %211 = vmatpush.msra.mxu3 %v20_v5  ;;  %v104_v11 = vshrl.u32 %v103_v10, 7  ;;  %v115_v17 = vperm.slane %v112_v12, 1  ;;  %v114_v20 = vperm.slane %v112_v12, 0  ;;  %vm136_vm10 = vcmask 1040384   ;;  %s239_s7 = smov [#allocation2]   ;;  %s186_s11 = sshll.u32 %s323_s3, 4  ;;  %s187_s11 = int_to_ptr.hbm [resolvable:$true] %s186_s11 }
   0x8   :  { %196 = vmatmul.msk.f32.vlgmr.msra.gmra.mxu0 %vm25_vm1, %v15_v6  ;;  %198 = vmatmul.msk.f32.vlgmr.msra.gmra.mxu2 %vm25_vm1, %v17_v7  ;;  %vm151_vm12 = vcmask 581632   ;;  %v205_v58 = vld [vmem:[%s322_s2 + $0x1] ss:$2 sm:$0x3]  ;;  %vm176_vm13 = vcmask 588804   ;;  %s184_s8 = sshll.u32 %s239_s7, 4  ;;  %s185_s8 = int_to_ptr.vmem [resolvable:$true] %s184_s8 }
   0x9   :  { %201 = vmatmul.msk.f32.vlgmr.msra.gmra.mxu1 %vm25_vm1, %v15_v6  ;;  %203 = vmatmul.msk.f32.vlgmr.msra.gmra.mxu3 %vm25_vm1, %v17_v7  ;;  %v105_v13 = vadd.s32 8, %v104_v11  ;;  %v108_v15 = vcvt.s32.f32 %v104_v11  ;;  %v106_v18 = vadd.s32 16, %v104_v11  ;;  %v107_v21 = vadd.s32 24, %v104_v11  ;;  %vm177_vm14 = vmor %vm176_vm13, %vm38_vm0 }
   0xa   :  { %v163_v62 = vperm.slane %v205_v58, 0  ;;  %v164_v63 = vperm.slane %v205_v58, 1 }
   0xb   :  { %v109_v19 = vcvt.s32.f32 %v105_v13  ;;  %vm297_vm2 = vcmp.eq.f32.partialorder %v108_v15, %v115_v17  ;;  %v110_v23 = vcvt.s32.f32 %v106_v18  ;;  %vm118_vm4 = vcmp.eq.f32.partialorder %v108_v15, %v114_v20 }
   0xc   :  { %v111_v28 = vcvt.s32.f32 %v107_v21 }
   0xd   :  { %vm120_vm3 = vcmp.eq.f32.partialorder %v109_v19, %v114_v20  ;;  %vm121_vm5 = vcmp.eq.f32.partialorder %v109_v19, %v115_v17  ;;  %vm303_vm7 = vcmp.eq.f32.partialorder %v110_v23, %v115_v17  ;;  %vm122_vm8 = vcmp.eq.f32.partialorder %v110_v23, %v114_v20 }
   0xe   :  { %vm124_vm9 = vcmp.eq.f32.partialorder %v111_v28, %v114_v20  ;;  %vm125_vm11 = vcmp.eq.f32.partialorder %v111_v28, %v115_v17 }
  0x10   :  { %197 = vmatmul.msk.f32.gmra.mxu0 %vm25_vm1, %v16_v8  ;;  %199 = vmatmul.msk.f32.gmra.mxu2 %vm25_vm1, %v18_v9 }
  0x11   :  { %202 = vmatmul.msk.f32.gmra.mxu1 %vm25_vm1, %v16_v8  ;;  %204 = vmatmul.msk.f32.gmra.mxu3 %vm25_vm1, %v18_v9 }
  0x85   :  { %v62_v14 = vpop.f32.mrf.mxu0 }
  0x86   :  { %v91_v16 = vpop.f32.mrf.mxu1  ;;  %v126_v32 = vsel %vm118_vm4, %v62_v14, 0.0 }
  0x87   :  { %v127_v26 = vsel %vm297_vm2, %v91_v16, 0.0 }
  0x88   :  { %v146_v34 = vsel %vm145_vm6, %v127_v26, 0.0 }
  0x8b   :  { %v68_v24 = vpop.f32.mrf.mxu2 }
  0x8c   :  { %v97_v25 = vpop.f32.mrf.mxu3  ;;  %v130_v39 = vsel %vm122_vm8, %v68_v24, 0.0 }
  0x8d   :  { %v65_v27 = vpop.f32.mrf.mxu0  ;;  %v131_v37 = vsel %vm303_vm7, %v97_v25, 0.0 }
  0x8e   :  { %v128_v30 = vsel %vm120_vm3, %v65_v27, 0.0  ;;  %v94_v31 = vpop.f32.mrf.mxu1  ;;  %v149_v41 = vsel %vm145_vm6, %v131_v37, 0.0 }
  0x8f   :  { %v129_v33 = vsel %vm121_vm5, %v94_v31, 0.0  ;;  %v134_v35 = vadd.f32 %v128_v30, %v126_v32 }
  0x90   :  { %v147_v36 = vsel %vm145_vm6, %v129_v33, 0.0 }
  0x91   :  { %v148_v38 = vadd.f32 %v147_v36, %v146_v34  ;;  %v135_v42 = vadd.f32 %v134_v35, %v130_v39 }
  0x93   :  { %v71_v40 = vpop.f32.mrf.mxu2  ;;  %v150_v47 = vadd.f32 %v149_v41, %v148_v38 }
  0x94   :  { %v132_v43 = vsel %vm124_vm9, %v71_v40, 0.0  ;;  %v100_v44 = vpop.f32.mrf.mxu3 }
  0x95   :  { %v137_v45 = vsel %vm136_vm10, %v132_v43, 0.0  ;;  %v133_v46 = vsel %vm125_vm11, %v100_v44, 0.0 }
  0x96   :  { %v138_v48 = vadd.f32 %v137_v45, %v135_v42  ;;  %v152_v49 = vsel %vm151_vm12, %v133_v46, 0.0 }
  0x97   :  { %v153_v50 = vadd.f32 %v152_v49, %v150_v47 }
  0x98   :  { %v139_v51 = vrot.slane %v138_v48, 4 }
  0x99   :  { %v154_v52 = vrot.slane %v153_v50, 4 }
  0x9a   :  { %v140_v53 = vadd.f32 %v139_v51, %v138_v48 }
  0x9b   :  { %v155_v54 = vadd.f32 %v154_v52, %v153_v50 }
  0x9c   :  { %v141_v55 = vrot.slane %v140_v53, 2 }
  0x9d   :  { %v156_v56 = vrot.slane %v155_v54, 2 }
  0x9e   :  { %v142_v57 = vadd.f32 %v141_v55, %v140_v53 }
  0x9f   :  { %v157_v59 = vadd.f32 %v156_v56, %v155_v54 }
  0xa0   :  { %v143_v60 = vrot.slane %v142_v57, 1 }
  0xa1   :  { %v158_v61 = vrot.slane %v157_v59, 1 }
  0xa2   :  { %v144_v0 = vadd.f32 %v143_v60, %v142_v57 }
  0xa3   :  { %v159_v1 = vadd.f32 %v158_v61, %v157_v59 }
  0xa4   :  { %v167_v2 = vadd.f32 %v163_v62, %v144_v0 }
  0xa5   :  { %v168_v3 = vadd.f32 %v164_v63, %v159_v1 }
  0xa6   :  { %v169_v5 = vperm.slane %v167_v2, 0 }
  0xa7   :  { %v170_v4 = vperm.slane %v168_v3, 0 }
  0xa9   :  { %v173_v6 = vrot.slane %v170_v4, 4 }
  0xab   :  { %v174_v7 = vsel %vm38_vm0, %v169_v5, %v173_v6 }
  0xac   :  { %178 = vst.msk [vmem:[#allocation2] sm:$0xff] %vm177_vm14, %v174_v7 }
  0xad   :  { %189 = dma.vmem_to_hbm [thread:$0]  %s185_s8, 128, %s187_s11, [#allocation3]  }
  0xae   :  { %237 = dma.done.wait [#allocation3], 128  }
  0xaf   :  { %238 = vsyncadd [#allocation3], 4294967168 }
  0xb0   :  { %194 = vsyncpa [#allocation3], 1 }

</bundles_post_ra>
